<compile_context>
chip_gen: v6e
topology: v6e:2x2x1
jax: 0.10.0
libtpu: 0.0.40
codegen_flags: <defaults>
</compile_context>

<pallas_src>
import functools

import jax
import jax.numpy as jnp
from jax.experimental import pallas as pl
from jax.experimental.pallas import tpu as pltpu


def _round_up(x, m):
    return (x + m - 1) // m * m


def _vmem_capacity_bytes():
    """Physical VMEM per TensorCore; conservative 64 MiB (v7x) fallback."""
    try:
        info = pltpu.get_tpu_info()
        cap = getattr(info, "vmem_capacity_bytes", None)
        if cap:
            return int(cap)
    except Exception:
        pass
    return 64 * 2**20


def _tile_bytes(bt, r, dp, e, in_itemsize, out_itemsize):
    """Rough per-grid-step VMEM footprint (double-buffered ins/outs + temps)."""
    rows = bt * r
    return int(
        2 * rows * dp * in_itemsize      # images tile (2 buffers, input dtype)
        + rows * dp * 2                  # in-kernel bf16 copy of images tile
        + 2 * dp * e * 2                 # weight (bf16, 2 buffers)
        + 2 * e * 4                      # bias
        + 2 * bt * rows * 4              # averaging matrix
        + 2 * rows * e * out_itemsize    # feat out (2 buffers)
        + 2 * bt * e * out_itemsize      # mean out (2 buffers)
        + 3 * rows * e * 4               # f32 temporaries (y, y*y, feat)
    )


def _choose_bt(batch_padded, regions, dp, e, in_itemsize, out_itemsize,
               vmem_budget, *, target_rows=256, min_grid=4):
    """Pick batch elements per grid step.

    Bt is always a multiple of 8 that divides the (8-padded) batch, fits the
    VMEM budget, and ideally (a) gives >= target_rows matmul rows to fill the
    MXU M dimension and (b) leaves a grid of >= min_grid steps so megacore
    sharding and DMA/compute pipelining remain effective.
    """
    cands = [bt for bt in range(8, batch_padded + 1, 8)
             if batch_padded % bt == 0
             and _tile_bytes(bt, regions, dp, e, in_itemsize,
                             out_itemsize) <= vmem_budget]
    if not cands:
        cands = [8]
    for bt in cands:                      # smallest Bt meeting both goals
        if bt * regions >= target_rows and batch_padded // bt >= min_grid:
            return bt
    for bt in reversed(cands):            # else keep the grid long
        if batch_padded // bt >= min_grid:
            return bt
    for bt in reversed(cands):            # else at least 2 steps
        if batch_padded // bt >= 2:
            return bt
    return cands[0]                       # tiny batches: single step of 8 rows


def _encoder_kernel(x_ref, w_ref, b_ref, avg_ref, mean_ref, feat_ref,
                    *, no_imgnorm):
    # x_ref:    (Bt*R, Dp)  region features, input dtype (e.g. f32)
    # w_ref:    (Dp, E)     bf16 effective (weight-normalized) weight, transposed
    # b_ref:    (1, E)      f32 bias
    # avg_ref:  (Bt, Bt*R)  f32 block-diagonal averaging matrix (entries 1/R)
    # mean_ref: (Bt, E)     per-batch mean output
    # feat_ref: (Bt*R, E)   per-region embedding output
    x = x_ref[...].astype(jnp.bfloat16)          # VPU cast, hides under the MXU
    y = jnp.dot(x, w_ref[...], preferred_element_type=jnp.float32)
    y = y + b_ref[...]                           # (Bt*R, E) f32

    if no_imgnorm:
        feat = y
    else:
        # l2norm along the last dim: X / (sqrt(sum(X^2, -1)) + eps).
        norm = jnp.sqrt(jnp.sum(y * y, axis=-1, keepdims=True)) + 1e-8
        feat = y * pl.reciprocal(norm, approx=True)   # EUP slot, ~free

    feat_ref[...] = feat.astype(feat_ref.dtype)
    # Per-batch mean over regions as a tiny f32 matmul (no 3-D reshape).
    mean_ref[...] = jnp.dot(avg_ref[...], feat,
                            preferred_element_type=jnp.float32
                            ).astype(mean_ref.dtype)


def encoder_image_weightnorm_precomp(images, v, g, bias, no_imgnorm=False):
    """images: (B, R, D); v: (E, D); g: scalar; bias: (E,).

    Returns (mean_over_regions (B, E), per_region_features (B, R, E)),
    matching EncoderImageWeightNormPrecomp.forward.
    """
    B, R, D = images.shape
    E = v.shape[0]
    out_dtype = images.dtype
    in_itemsize = jnp.dtype(images.dtype).itemsize
    out_itemsize = jnp.dtype(out_dtype).itemsize

    # weight_norm(dim=None): W_eff = g * v / ||v||_F   (cheap parameter glue)
    v32 = v.astype(jnp.float32)
    w_eff = (g.astype(jnp.float32) * v32
             * jax.lax.rsqrt(jnp.sum(v32 * v32))).T           # (D, E) f32

    # Lane-align D only when necessary (zero pad is exact for the matmul).
    Dp = _round_up(D, 128)
    # Pad batch to a multiple of 8 so every block dim is sublane-legal without
    # a whole-batch fallback.  Padded rows are zeros; their outputs are sliced.
    Bp = _round_up(B, 8)

    x = images
    if Bp != B or Dp != D:
        x = jnp.pad(x, ((0, Bp - B), (0, 0), (0, Dp - D)))
    x2d = x.reshape(Bp * R, Dp)                  # free reinterpretation

    w_p = w_eff
    if Dp != D:
        w_p = jnp.pad(w_p, ((0, Dp - D), (0, 0)))
    w_p = w_p.astype(jnp.bfloat16)               # tiny parameter, wrapper cast ok
    bias2d = bias.astype(jnp.float32).reshape(1, E)

    # VMEM-budget- and megacore-aware tile selection.
    cap = _vmem_capacity_bytes()
    budget = int(0.70 * cap)
    target_rows = 512 if cap >= 100 * 2**20 else 256   # bigger tiles on v5e/v6e
    Bt = _choose_bt(Bp, R, Dp, E, in_itemsize, out_itemsize, budget,
                    target_rows=target_rows, min_grid=4)
    grid = (Bp // Bt,)

    # Block-diagonal averaging matrix: A[i, j] = 1/R if j // R == i else 0.
    row = jnp.arange(Bt, dtype=jnp.int32)
    col = jnp.arange(Bt * R, dtype=jnp.int32)
    avg_mat = jnp.where((col[None, :] // R) == row[:, None],
                        1.0 / R, 0.0).astype(jnp.float32)      # (Bt, Bt*R)

    vmem_need = _tile_bytes(Bt, R, Dp, E, in_itemsize, out_itemsize)
    vmem_limit = int(min(int(0.85 * cap),
                         max(32 * 2**20, int(vmem_need * 1.25))))

    kernel = functools.partial(_encoder_kernel, no_imgnorm=no_imgnorm)

    mean_out, feat2d = pl.pallas_call(
        kernel,
        out_shape=(
            jax.ShapeDtypeStruct((Bp, E), out_dtype),
            jax.ShapeDtypeStruct((Bp * R, E), out_dtype),
        ),
        grid_spec=pltpu.PrefetchScalarGridSpec(
            num_scalar_prefetch=0,
            grid=grid,
            in_specs=[
                pl.BlockSpec((Bt * R, Dp), lambda b: (b, 0)),
                # TODO(synk): mark these grid-invariant operands single-buffered
                # (pipeline_mode=pl.Buffered(1)) to save a redundant VMEM buffer.
                pl.BlockSpec((Dp, E), lambda b: (0, 0)),
                pl.BlockSpec((1, E), lambda b: (0, 0)),
                pl.BlockSpec((Bt, Bt * R), lambda b: (0, 0)),
            ],
            out_specs=[
                pl.BlockSpec((Bt, E), lambda b: (b, 0)),
                pl.BlockSpec((Bt * R, E), lambda b: (b, 0)),
            ],
        ),
        compiler_params=pltpu.CompilerParams(
            dimension_semantics=("parallel",),
            vmem_limit_bytes=vmem_limit,
        ),
    )(x2d, w_p, bias2d, avg_mat)

    if Bp != B:
        mean_out = mean_out[:B]
        feat2d = feat2d[:B * R]
    feat_out = feat2d.reshape(B, R, E)
    return mean_out, feat_out
    # TODO(synk): for very large D on v7x (64 MiB VMEM), tile K with a trailing
    # 'arbitrary' grid axis + f32 accumulator scratch instead of growing the
    # images block; not needed at these shapes.


def _reference(images, v, g, bias, no_imgnorm=False):
    w_eff = g * v / jnp.sqrt(jnp.sum(v * v))
    y = jnp.einsum("brd,ed->bre", images, w_eff) + bias
    if not no_imgnorm:
        norm = jnp.sqrt(jnp.sum(y * y, axis=-1, keepdims=True)) + 1e-8
        y = y / norm
    return y.mean(axis=1), y


if __name__ == "__main__":
    key = jax.random.PRNGKey(0)
    B, R, D, E = 2, 8, 32, 32   # batch, regions, img_dim, embed_size

    k1, k2, k3 = jax.random.split(key, 3)
    images = jax.random.normal(k1, (B, R, D), dtype=jnp.float32)
    v = jax.random.normal(k2, (E, D), dtype=jnp.float32) * 0.1    # Linear weight direction
    bias = jax.random.normal(k3, (E,), dtype=jnp.float32) * 0.01  # Linear bias
    g = jnp.sqrt(jnp.sum(v * v))  # weight_norm init: g = ||v||_F (scalar, dim=None)

    mean_out, feat_out = encoder_image_weightnorm_precomp(images, v, g, bias)
    jax.block_until_ready((mean_out, feat_out))

    ref_mean, ref_feat = _reference(images, v, g, bias)
    # bf16 matmul operands + approx reciprocal -> relaxed tolerance vs f32 ref.
    assert mean_out.shape == ref_mean.shape and feat_out.shape == ref_feat.shape
    assert jnp.allclose(mean_out, ref_mean, atol=2e-2, rtol=2e-2)
    assert jnp.allclose(feat_out, ref_feat, atol=2e-2, rtol=2e-2)
    print("KERNEL_OK")
</pallas_src>

<mosaic_0001>
module attributes {stable_mosaic.version = 11 : i64} {
  func.func @_encoder_kernel(%arg0: i32, %arg1: memref<64x128xf32, #tpu.memory_space<vmem>>, %arg2: memref<128x32xbf16, #tpu.memory_space<vmem>>, %arg3: memref<1x32xf32, #tpu.memory_space<vmem>>, %arg4: memref<8x64xf32, #tpu.memory_space<vmem>>, %arg5: memref<8x32xf32, #tpu.memory_space<vmem>>, %arg6: memref<64x32xf32, #tpu.memory_space<vmem>>) attributes {dimension_semantics = [#tpu.dimension_semantics<parallel>], iteration_bounds = array<i64: 1>, scalar_prefetch = 0 : i64, scratch_operands = 0 : i64, tpu.core_type = #tpu.core_type<tc>, window_params = [{transform_indices = @transform_0, window_bounds = array<i64: 64, 128>}, {pipeline_mode = #tpu.pipeline_mode<synchronous>, transform_indices = @transform_1, window_bounds = array<i64: 128, 32>}, {pipeline_mode = #tpu.pipeline_mode<synchronous>, transform_indices = @transform_2, window_bounds = array<i64: 1, 32>}, {pipeline_mode = #tpu.pipeline_mode<synchronous>, transform_indices = @transform_3, window_bounds = array<i64: 8, 64>}, {transform_indices = @transform_4, window_bounds = array<i64: 8, 32>}, {transform_indices = @transform_5, window_bounds = array<i64: 64, 32>}]} {
    %c0 = arith.constant 0 : index
    %c0_0 = arith.constant 0 : index
    %0 = vector.load %arg1[%c0, %c0_0] : memref<64x128xf32, #tpu.memory_space<vmem>>, vector<64x128xf32>
    %1 = arith.truncf %0 : vector<64x128xf32> to vector<64x128xbf16>
    %c0_1 = arith.constant 0 : index
    %c0_2 = arith.constant 0 : index
    %2 = vector.load %arg2[%c0_1, %c0_2] : memref<128x32xbf16, #tpu.memory_space<vmem>>, vector<128x32xbf16>
    %cst = arith.constant dense<0.000000e+00> : vector<64x32xf32>
    %3 = tpu.matmul %1, %2, %cst {dimension_numbers = #tpu.dot_dimension_numbers<[1], [0], [0], [1], [0, 0, 1, 1], [], []>} : vector<64x128xbf16>, vector<128x32xbf16>, vector<64x32xf32> -> vector<64x32xf32>
    %c0_3 = arith.constant 0 : index
    %c0_4 = arith.constant 0 : index
    %4 = vector.load %arg3[%c0_3, %c0_4] : memref<1x32xf32, #tpu.memory_space<vmem>>, vector<1x32xf32>
    %5 = vector.broadcast %4 : vector<1x32xf32> to vector<64x32xf32>
    %6 = arith.addf %3, %5 : vector<64x32xf32>
    %7 = arith.mulf %6, %6 : vector<64x32xf32>
    %cst_5 = arith.constant dense<0.000000e+00> : vector<64xf32>
    %8 = vector.multi_reduction <add>, %7, %cst_5 [1] : vector<64x32xf32> to vector<64xf32>
    %9 = vector.shape_cast %8 : vector<64xf32> to vector<64x1xf32>
    %10 = math.sqrt %9 : vector<64x1xf32>
    %cst_6 = arith.constant 9.99999993E-9 : f32
    %11 = vector.broadcast %cst_6 : f32 to vector<64x1xf32>
    %12 = arith.addf %10, %11 : vector<64x1xf32>
    %13 = tpu.reciprocal %12 {approx = true} : vector<64x1xf32> -> vector<64x1xf32>
    %14 = vector.broadcast %13 : vector<64x1xf32> to vector<64x32xf32>
    %15 = arith.mulf %6, %14 : vector<64x32xf32>
    %c0_7 = arith.constant 0 : index
    %c0_8 = arith.constant 0 : index
    %16 = vector.load %arg6[%c0_7, %c0_8] : memref<64x32xf32, #tpu.memory_space<vmem>>, vector<64x32xf32>
    tpu.vector_store %arg6[%c0_7, %c0_8], %15 {strides = array<i32>} : memref<64x32xf32, #tpu.memory_space<vmem>>, vector<64x32xf32>,
    %c0_9 = arith.constant 0 : index
    %c0_10 = arith.constant 0 : index
    %17 = vector.load %arg4[%c0_9, %c0_10] : memref<8x64xf32, #tpu.memory_space<vmem>>, vector<8x64xf32>
    %cst_11 = arith.constant dense<0.000000e+00> : vector<8x32xf32>
    %18 = tpu.matmul %17, %15, %cst_11 {dimension_numbers = #tpu.dot_dimension_numbers<[1], [0], [0], [1], [0, 0, 1, 1], [], []>} : vector<8x64xf32>, vector<64x32xf32>, vector<8x32xf32> -> vector<8x32xf32>
    %c0_12 = arith.constant 0 : index
    %c0_13 = arith.constant 0 : index
    %19 = vector.load %arg5[%c0_12, %c0_13] : memref<8x32xf32, #tpu.memory_space<vmem>>, vector<8x32xf32>
    tpu.vector_store %arg5[%c0_12, %c0_13], %18 {strides = array<i32>} : memref<8x32xf32, #tpu.memory_space<vmem>>, vector<8x32xf32>,
    return
  }
  func.func @transform_0(%arg0: i32) -> (i32, i32) {
    %c0_i32 = arith.constant 0 : i32
    %c0_i32_0 = arith.constant 0 : i32
    return %arg0, %c0_i32 : i32, i32
  }
  func.func @transform_1(%arg0: i32) -> (i32, i32) {
    %c0_i32 = arith.constant 0 : i32
    %c0_i32_0 = arith.constant 0 : i32
    %c0_i32_1 = arith.constant 0 : i32
    return %c0_i32, %c0_i32_0 : i32, i32
  }
  func.func @transform_2(%arg0: i32) -> (i32, i32) {
    %c0_i32 = arith.constant 0 : i32
    %c0_i32_0 = arith.constant 0 : i32
    %c0_i32_1 = arith.constant 0 : i32
    return %c0_i32, %c0_i32_0 : i32, i32
  }
  func.func @transform_3(%arg0: i32) -> (i32, i32) {
    %c0_i32 = arith.constant 0 : i32
    %c0_i32_0 = arith.constant 0 : i32
    %c0_i32_1 = arith.constant 0 : i32
    return %c0_i32, %c0_i32_0 : i32, i32
  }
  func.func @transform_4(%arg0: i32) -> (i32, i32) {
    %c0_i32 = arith.constant 0 : i32
    %c0_i32_0 = arith.constant 0 : i32
    return %arg0, %c0_i32 : i32, i32
  }
  func.func @transform_5(%arg0: i32) -> (i32, i32) {
    %c0_i32 = arith.constant 0 : i32
    %c0_i32_0 = arith.constant 0 : i32
    return %arg0, %c0_i32 : i32, i32
  }
}

</mosaic_0001>

<bundles_post_ra>
// kernel: tpu_custom_call.1
= control target key start
LH: loop header
LB: loop body
LE: loop exit
PB: predicated region body
PF: predicated region fallthrough
CT: control target
= control target key end

     0   :  { %s719_s0 = inlined_call_operand.vmem [shape: f32[64,128], index: 0, kind: input, shape index: {}]   ;;  %s720_s1 = inlined_call_operand.vmem [shape: bf16[128,32], index: 1, kind: input, shape index: {}]   ;;  %s721_s2 = inlined_call_operand.vmem [shape: f32[1,32], index: 2, kind: input, shape index: {}]   ;;  %s722_s3 = inlined_call_operand.vmem [shape: f32[8,64], index: 3, kind: input, shape index: {}]   ;;  %s723_s4 = inlined_call_operand.hbm [shape: f32[8,32], index: 4, kind: output, shape index: {0}]   ;;  %s724_s5 = inlined_call_operand.vmem [shape: f32[64,32], index: 5, kind: output, shape index: {1}]  }
   0x1   :  { %v461_v0 = vld [vmem:[%s720_s1 + $0x38] sm:$0xff]   ;;  %v462_v1 = vld [vmem:[%s720_s1 + $0x30] sm:$0xff]   ;;  %v463_v2 = vld [vmem:[%s720_s1 + $0x28] sm:$0xff]  }
   0x2   :  { %415 = vmatprep.subr.bf16.mxu0 %v461_v0  ;;  %v464_v3 = vld [vmem:[%s720_s1 + $0x20] sm:$0xff]   ;;  %v22_v5 = vld [vmem:[%s719_s0 + $0x8] sm:$0xff] }
   0x3   :  { %416 = vmatpush3.bf16.msra.mxu0 %v461_v0  ;;  %v21_v4 = vld [vmem:[%s719_s0] sm:$0xff] }
   0x4   :  { %417 = vmatprep.subr.bf16.mxu0 %v462_v1  ;;  %v29_v6 = vpack.c.bf16 %v22_v5, %v21_v4 }
   0x7   :  { %418 = vmatpush3.bf16.msra.mxu0 %v462_v1 }
   0x8   :  { %419 = vmatprep.subr.bf16.mxu0 %v463_v2 }
   0x9   :  { %11 = vsyncpa [#allocation3], 0  ;;  %431 = vmatprep.mubr.bf16.mxu0 %v29_v6  ;;  %v465_v7 = vld [vmem:[%s720_s1 + $0x18] sm:$0xff]   ;;  %v466_v8 = vld [vmem:[%s720_s1 + $0x10] sm:$0xff]   ;;  %vm177_vm0 = vcmask 261120   ;;  %v523_v53 = vmov 0.0  }
   0xa   :  { %v467_v9 = vld [vmem:[%s720_s1 + $0x8] sm:$0xff]   ;;  %v468_v10 = vld [vmem:[%s720_s1] sm:$0xff]   ;;  %v23_v11 = vld [vmem:[%s719_s0 + $0x10] sm:$0xff]  ;;  %439 = vmatprep.subr.mxu1 %v523_v53  ;;  %vm524_vm1 = vmmov 0   ;;  %s525_s17 = smov [#allocation2]  }
   0xb   :  { %420 = vmatpush3.bf16.msra.mxu0 %v463_v2  ;;  %v24_v12 = vld [vmem:[%s719_s0 + $0x18] sm:$0xff]  ;;  %v25_v13 = vld [vmem:[%s719_s0 + $0x20] sm:$0xff]  ;;  %v26_v14 = vld [vmem:[%s719_s0 + $0x28] sm:$0xff]  ;;  %455 = vmatprep.mubr.msk.f32.mxu1 %vm524_vm1, %v523_v53  ;;  %s372_s18 = sshll.u32 %s525_s17, 4  ;;  %s373_s18 = int_to_ptr.vmem [resolvable:$true] %s372_s18 }
   0xc   :  { %421 = vmatprep.subr.bf16.mxu0 %v464_v3  ;;  %v30_v15 = vpack.c.bf16 %v24_v12, %v23_v11  ;;  %v31_v16 = vpack.c.bf16 %v26_v14, %v25_v13  ;;  %v27_v17 = vld [vmem:[%s719_s0 + $0x30] sm:$0xff]  ;;  %v28_v18 = vld [vmem:[%s719_s0 + $0x38] sm:$0xff]  ;;  %v384_v26 = vld [vmem:[%s721_s2] ss:$0 sm:$0xff]  ;;  %s501_s19 = scalar_lea.vmem %s373_s18, 128  ;;  %p506_p1 = scmp.lt.s32.totalorder %s373_s18, %s373_s18 }
   0xd   :  { %v32_v19 = vpack.c.bf16 %v28_v18, %v27_v17  ;;  %p502_p0 = scmp.ne.s32.totalorder %s373_s18, %s501_s19  ;;  %p507_p2 = scmp.lt.s32.totalorder %s501_s19, %s501_s19 }
   0xf   :  { %422 = vmatpush3.bf16.msra.mxu0 %v464_v3  ;;  %p508_p3 = por %p507_p2, %p506_p1 }
  0x10   :  { %423 = vmatprep.subr.bf16.mxu0 %v465_v7 }
  0x11   :  { %p509_p4 = pnand %p508_p3, %p502_p0 }
  0x13   :  { %424 = vmatpush3.bf16.msra.mxu0 %v465_v7 }
  0x14   :  { %425 = vmatprep.subr.bf16.mxu0 %v466_v8 }
  0x17   :  { %426 = vmatpush3.bf16.msra.mxu0 %v466_v8 }
  0x18   :  { %427 = vmatprep.subr.bf16.mxu0 %v467_v9 }
  0x1b   :  { %428 = vmatpush3.bf16.msra.mxu0 %v467_v9 }
  0x1c   :  { %429 = vmatprep.subr.bf16.mxu0 %v468_v10 }
  0x1f   :  { %430 = vmatpush3.bf16.msra.mxu0 %v468_v10 }
  0x22   :  { %432 = vmatmul.mubr.bf16.vlgmr.msra.gmra.mxu0 %v30_v15 }
  0x23   :  { %435 = vmatprep.mubr.bf16.mxu0 %v31_v16 }
  0x2a   :  { %436 = vmatmul.mubr.bf16.gmra.mxu0 %v32_v19 }
  0xe2   :  { %v433_v20 = vpop.f32.mrf.mxu0 }
  0xe3   :  { %v624_v38 = vadd.f32 %v433_v20, %v384_v26 }
  0xe4   :  { %v138_v21 = vpop.f32.mrf.mxu0 }
  0xe5   :  { %v634_v44 = vadd.f32 %v384_v26, %v138_v21  ;;  %v171_v46 = vmul.f32 %v624_v38, %v624_v38 }
  0xe6   :  { %v434_v22 = vpop.f32.mrf.mxu0 }
  0xe7   :  { %v617_v34 = vadd.f32 %v434_v22, %v384_v26  ;;  %v184_v49 = vsel %vm177_vm0, %v171_v46, 0.0  ;;  %v169_v50 = vmul.f32 %v634_v44, %v634_v44 }
  0xe8   :  { %v141_v23 = vpop.f32.mrf.mxu0 }
  0xe9   :  { %v629_v41 = vadd.f32 %v384_v26, %v141_v23  ;;  %v172_v43 = vmul.f32 %v617_v34, %v617_v34  ;;  %v178_v52 = vsel %vm177_vm0, %v169_v50, 0.0 }
  0xea   :  { %v437_v24 = vpop.f32.mrf.mxu0 }
  0xeb   :  { %v607_v28 = vadd.f32 %v437_v24, %v384_v26  ;;  %v187_v47 = vsel %vm177_vm0, %v172_v43, 0.0  ;;  %v170_v48 = vmul.f32 %v629_v41, %v629_v41 }
  0xec   :  { %v154_v25 = vpop.f32.mrf.mxu0 }
  0xed   :  { %v611_v31 = vadd.f32 %v384_v26, %v154_v25  ;;  %v175_v37 = vmul.f32 %v607_v28, %v607_v28  ;;  %v181_v51 = vsel %vm177_vm0, %v170_v48, 0.0 }
  0xee   :  { %v438_v27 = vpop.f32.mrf.mxu0 }
  0xef   :  { %v609_v29 = vadd.f32 %v438_v27, %v384_v26  ;;  %v173_v40 = vmul.f32 %v611_v31, %v611_v31  ;;  %v196_v42 = vsel %vm177_vm0, %v175_v37, 0.0 }
  0xf0   :  { %v157_v30 = vpop.f32.mrf.mxu0 }
  0xf1   :  { %v613_v32 = vadd.f32 %v384_v26, %v157_v30  ;;  %v176_v33 = vmul.f32 %v609_v29, %v609_v29  ;;  %v190_v45 = vsel %vm177_vm0, %v173_v40, 0.0 }
  0xf3   :  { %v199_v35 = vsel %vm177_vm0, %v176_v33, 0.0  ;;  %v174_v36 = vmul.f32 %v613_v32, %v613_v32 }
  0xf4   :  { %200 = vadd.xlane.f32.xlu0 %v199_v35 }
  0xf5   :  { %v193_v39 = vsel %vm177_vm0, %v174_v36, 0.0 }
  0xf6   :  { %194 = vadd.xlane.f32.xlu1 %v193_v39 }
  0xf8   :  { %197 = vadd.xlane.f32.xlu0 %v196_v42 }
  0xfa   :  { %191 = vadd.xlane.f32.xlu1 %v190_v45 }
  0xfc   :  { %188 = vadd.xlane.f32.xlu0 %v187_v47 }
  0xfe   :  { %185 = vadd.xlane.f32.xlu1 %v184_v49 }
 0x100   :  { %182 = vadd.xlane.f32.xlu0 %v181_v51 }
 0x102   :  { %179 = vadd.xlane.f32.xlu1 %v178_v52 }
 0x17d   :  { %v201_v54 = vpop.xlane.xlu0 %200 }
 0x17e   :  { %469 = vrsqrt.f32 %v201_v54  ;;  %vm253_vm2 = vcmp.eq.f32.partialorder %v201_v54, inf  ;;  %v256_v1 = vand.u32 2147483648, %v201_v54  ;;  %vm255_vm3 = vcmp.eq.f32.partialorder %v201_v54, 0.0 }
 0x17f   :  { %v195_v55 = vpop.xlane.xlu1 %194 }
 0x180   :  { %471 = vrsqrt.f32 %v195_v55  ;;  %vm239_vm4 = vcmp.eq.f32.partialorder %v195_v55, inf  ;;  %v242_v6 = vand.u32 2147483648, %v195_v55  ;;  %vm241_vm5 = vcmp.eq.f32.partialorder %v195_v55, 0.0 }
 0x181   :  { %v198_v56 = vpop.xlane.xlu0 %197 }
 0x182   :  { %473 = vrsqrt.f32 %v198_v56  ;;  %vm246_vm6 = vcmp.eq.f32.partialorder %v198_v56, inf  ;;  %vm248_vm7 = vcmp.eq.f32.partialorder %v198_v56, 0.0  ;;  %v249_v12 = vand.u32 2147483648, %v198_v56 }
 0x183   :  { %v192_v57 = vpop.xlane.xlu1 %191 }
 0x184   :  { %475 = vrsqrt.f32 %v192_v57  ;;  %vm232_vm8 = vcmp.eq.f32.partialorder %v192_v57, inf  ;;  %vm234_vm9 = vcmp.eq.f32.partialorder %v192_v57, 0.0  ;;  %v235_v18 = vand.u32 2147483648, %v192_v57 }
 0x185   :  { %v189_v58 = vpop.xlane.xlu0 %188 }
 0x186   :  { %477 = vrsqrt.f32 %v189_v58  ;;  %vm225_vm10 = vcmp.eq.f32.partialorder %v189_v58, inf  ;;  %vm227_vm11 = vcmp.eq.f32.partialorder %v189_v58, 0.0  ;;  %v228_v24 = vand.u32 2147483648, %v189_v58 }
 0x187   :  { %v186_v59 = vpop.xlane.xlu1 %185 }
 0x188   :  { %479 = vrsqrt.f32 %v186_v59  ;;  %vm218_vm12 = vcmp.eq.f32.partialorder %v186_v59, inf  ;;  %vm220_vm13 = vcmp.eq.f32.partialorder %v186_v59, 0.0  ;;  %v221_v35 = vand.u32 2147483648, %v186_v59 }
 0x189   :  { %v649_v60 = vpop.xlane.xlu0 %182 }
 0x18a   :  { %481 = vrsqrt.f32 %v649_v60  ;;  %vm211_vm14 = vcmp.eq.f32.partialorder %v649_v60, inf  ;;  %vm213_vm15 = vcmp.eq.f32.partialorder %v649_v60, 0.0  ;;  %v214_v43 = vand.u32 2147483648, %v649_v60 }
 0x18b   :  { %v470_v61 = vpop.eup %469  ;;  %v652_v62 = vpop.xlane.xlu1 %179 }
 0x18c   :  { %v252_v63 = vmul.f32 %v470_v61, %v201_v54  ;;  %483 = vrsqrt.f32 %v652_v62  ;;  %vm204_vm1 = vcmp.eq.f32.partialorder %v652_v62, inf  ;;  %v207_v49 = vand.u32 2147483648, %v652_v62 }
 0x18d   :  { %v472_v0 = vpop.eup %471 }
 0x18e   :  { %v254_v2 = vsel %vm253_vm2, %v201_v54, %v252_v63  ;;  %v238_v3 = vmul.f32 %v472_v0, %v195_v55  ;;  %vm206_vm2 = vcmp.eq.f32.partialorder %v652_v62, 0.0 }
 0x18f   :  { %v474_v4 = vpop.eup %473  ;;  %v257_v5 = vsel %vm255_vm3, %v256_v1, %v254_v2  ;;  %vm291_vm3 = vcmask 523264  }
 0x190   :  { %v265_v7 = vadd.f32 1e-08, %v257_v5  ;;  %v240_v8 = vsel %vm239_vm4, %v195_v55, %v238_v3  ;;  %v245_v9 = vmul.f32 %v474_v4, %v198_v56 }
 0x191   :  { %v476_v10 = vpop.eup %475  ;;  %v243_v11 = vsel %vm241_vm5, %v242_v6, %v240_v8 }
 0x192   :  { %485 = vrcp.f32 %v265_v7  ;;  %v263_v13 = vadd.f32 1e-08, %v243_v11  ;;  %v247_v14 = vsel %vm246_vm6, %v198_v56, %v245_v9  ;;  %v231_v15 = vmul.f32 %v476_v10, %v192_v57 }
 0x193   :  { %v478_v16 = vpop.eup %477  ;;  %v250_v17 = vsel %vm248_vm7, %v249_v12, %v247_v14 }
 0x194   :  { %487 = vrcp.f32 %v263_v13  ;;  %v264_v19 = vadd.f32 1e-08, %v250_v17  ;;  %v233_v20 = vsel %vm232_vm8, %v192_v57, %v231_v15  ;;  %v224_v21 = vmul.f32 %v478_v16, %v189_v58 }
 0x195   :  { %v480_v22 = vpop.eup %479  ;;  %v236_v23 = vsel %vm234_vm9, %v235_v18, %v233_v20 }
 0x196   :  { %489 = vrcp.f32 %v264_v19  ;;  %v262_v25 = vadd.f32 1e-08, %v236_v23  ;;  %v226_v26 = vsel %vm225_vm10, %v189_v58, %v224_v21  ;;  %v217_v27 = vmul.f32 %v480_v22, %v186_v59 }
 0x197   :  { %v482_v30 = vpop.eup %481  ;;  %v229_v33 = vsel %vm227_vm11, %v228_v24, %v226_v26 }
 0x198   :  { %491 = vrcp.f32 %v262_v25  ;;  %v261_v36 = vadd.f32 1e-08, %v229_v33  ;;  %v219_v37 = vsel %vm218_vm12, %v186_v59, %v217_v27  ;;  %v210_v39 = vmul.f32 %v482_v30, %v649_v60 }
 0x199   :  { %v484_v40 = vpop.eup %483  ;;  %v222_v42 = vsel %vm220_vm13, %v221_v35, %v219_v37 }
 0x19a   :  { %493 = vrcp.f32 %v261_v36  ;;  %v260_v45 = vadd.f32 1e-08, %v222_v42  ;;  %v212_v46 = vsel %vm211_vm14, %v649_v60, %v210_v39  ;;  %v203_v47 = vmul.f32 %v484_v40, %v652_v62 }
 0x19b   :  { %v215_v48 = vsel %vm213_vm15, %v214_v43, %v212_v46 }
 0x19c   :  { %495 = vrcp.f32 %v260_v45  ;;  %v259_v50 = vadd.f32 1e-08, %v215_v48  ;;  %v205_v51 = vsel %vm204_vm1, %v652_v62, %v203_v47 }
 0x19d   :  { %v208_v52 = vsel %vm206_vm2, %v207_v49, %v205_v51 }
 0x19e   :  { %497 = vrcp.f32 %v259_v50  ;;  %v258_v54 = vadd.f32 1e-08, %v208_v52 }
 0x19f   :  { %v486_v55 = vpop.eup %485 }
 0x1a0   :  { %499 = vrcp.f32 %v258_v54  ;;  %v281_v56 = vmul.f32 %v486_v55, %v609_v29 }
 0x1a1   :  { %v488_v57 = vpop.eup %487 }
 0x1a2   :  { %289 = vst.msk [vmem:[%s724_s5 + $0x38] sm:$0xff] %vm177_vm0, %v281_v56  ;;  %440 = vmatpush3.msra.mxu1 %v281_v56  ;;  %v279_v58 = vmul.f32 %v488_v57, %v613_v32 }
 0x1a3   :  { %v490_v59 = vpop.eup %489  ;;  %441 = vmatprep.subr.mxu1 %v523_v53 }
 0x1a4   :  { %v280_v60 = vmul.f32 %v490_v59, %v607_v28  ;;  %287 = vst.msk [vmem:[%s724_s5 + $0x28] sm:$0xff] %vm177_vm0, %v279_v58 }
 0x1a5   :  { %v492_v29 = vpop.eup %491 }
 0x1a6   :  { %288 = vst.msk [vmem:[%s724_s5 + $0x30] sm:$0xff] %vm177_vm0, %v280_v60  ;;  %442 = vmatpush3.msra.mxu1 %v280_v60  ;;  %v278_v61 = vmul.f32 %v492_v29, %v611_v31 }
 0x1a7   :  { %v494_v32 = vpop.eup %493  ;;  %443 = vmatprep.subr.mxu1 %v523_v53 }
 0x1a8   :  { %444 = vmatpush3.msra.mxu1 %v279_v58  ;;  %286 = vst.msk [vmem:[%s724_s5 + $0x20] sm:$0xff] %vm177_vm0, %v278_v61  ;;  %v277_v28 = vmul.f32 %v494_v32, %v617_v34 }
 0x1a9   :  { %v496_v62 = vpop.eup %495  ;;  %445 = vmatprep.subr.mxu1 %v523_v53 }
 0x1aa   :  { %446 = vmatpush3.msra.mxu1 %v278_v61  ;;  %285 = vst.msk [vmem:[%s724_s5 + $0x18] sm:$0xff] %vm177_vm0, %v277_v28  ;;  %v276_v31 = vmul.f32 %v496_v62, %v624_v38 }
 0x1ab   :  { %v498_v63 = vpop.eup %497  ;;  %447 = vmatprep.subr.mxu1 %v523_v53 }
 0x1ac   :  { %448 = vmatpush3.msra.mxu1 %v277_v28  ;;  %284 = vst.msk [vmem:[%s724_s5 + $0x10] sm:$0xff] %vm177_vm0, %v276_v31  ;;  %v275_v34 = vmul.f32 %v498_v63, %v629_v41  ;;  %v290_v41 = vld [vmem:[%s722_s3] sm:$0xff] }
 0x1ad   :  { %v500_v0 = vpop.eup %499  ;;  %449 = vmatprep.subr.mxu1 %v523_v53 }
 0x1ae   :  { %450 = vmatpush3.msra.mxu1 %v276_v31  ;;  %283 = vst.msk [vmem:[%s724_s5 + $0x8] sm:$0xff] %vm177_vm0, %v275_v34  ;;  %v274_v38 = vmul.f32 %v500_v0, %v634_v44 }
 0x1af   :  { %451 = vmatprep.subr.mxu1 %v523_v53 }
 0x1b0   :  { %452 = vmatpush3.msra.mxu1 %v275_v34  ;;  %282 = vst.msk [vmem:[%s724_s5] sm:$0xff] %vm177_vm0, %v274_v38 }
 0x1b1   :  { %453 = vmatprep.subr.mxu1 %v523_v53 }
 0x1b2   :  { %454 = vmatpush3.msra.mxu1 %v274_v38 }
 0x1b3   :  { %456 = vmatmul.mubr.msk.f32.vlgmr.msra.gmra.mxu1 %vm291_vm3, %v290_v41 }
 0x273   :  { %v361_v44 = vpop.f32.mrf.mxu1 }
 0x274   :  { %365 = vst.msk [vmem:[#allocation2] sm:$0xff] %vm177_vm0, %v361_v44 }
 0x275   :  { %v457_v1 = vpop.f32.mrf.mxu1 }
 0x276   :  { %512 = shalt.err (!%p509_p4)
}
 0x277   :  { %375 = dma.vmem_to_hbm [thread:$0]  %s373_s18, 128, %s723_s4, [#allocation3]  }
 0x278   :  { %521 = dma.done.wait [#allocation3], 128  }
 0x279   :  { %522 = vsyncadd [#allocation3], 4294967168 }
 0x27a   :  { %383 = vsyncpa [#allocation3], 1 }

</bundles_post_ra>
